<compile_context>
chip_gen: v7x
topology: tpu7x:2x2x1
jax: 0.10.0
libtpu: 0.0.40
codegen_flags: <defaults>
</compile_context>

<pallas_src>
import functools

import jax
import jax.numpy as jnp
from jax import lax
from jax.experimental import pallas as pl
from jax.experimental.pallas import tpu as pltpu


def _conv_tanh_abs_pool_kernel(x_ref, w_ref, b_ref, o_ref, *, L, G):
    """One block (= Nb batch elements) per grid step.

    x_ref : (1, K, G*L)   bf16  im2col columns, lane order (g, n_local, ph, pw)
    w_ref : (Cout, K)     bf16  conv weights, row t = cin*KH*KW + kh*KW + kw
    b_ref : (Cout, 1)     f32   conv bias
    o_ref : (1, Cout, L)  f32   pooled output, L = Nb*PH*PW (128 lanes for the demo)
    """
    # Single MXU matmul, bf16 operands at native rate, f32 accumulation.
    y = jnp.dot(w_ref[...], x_ref[0], preferred_element_type=jnp.float32)  # (Cout, G*L)

    # Fused bias + tanh + abs epilogue (VPU/EUP) over the whole tile.
    y = jnp.abs(jnp.tanh(y + b_ref[...]))

    # MaxPool2d(P, stride=2): columns are grouped by pool offset g, each group is a
    # contiguous, vreg-aligned L-lane slice -> pooling is G-1 whole-vreg vmax ops.
    pooled = y[:, 0:L]
    for g in range(1, G):
        pooled = jnp.maximum(pooled, y[:, g * L:(g + 1) * L])

    # Lane-dense (Cout, L) store: unmasked vst when L is a multiple of 128.
    o_ref[0] = pooled


def _build_operands(x_nchw, weight, bias, *, padding, pooling_size):
    """Wrapper-side im2col + pool regrouping, directly from (padded) NCHW.

    Lane index within a block = g*(Nb*HW) + n_local*HW + ph*PW + pw, where
    g = dh*P + dw is the pooling-window offset.  Column (g, n, ph, pw) holds the K input
    values the conv needs at output position (2*ph+dh, 2*pw+dw) of batch element n.
    For P == stride == 2 the groups tile the conv output exactly; for P > 2 some conv
    positions are duplicated (correct, small redundancy).
    """
    N, Cin, H, W = x_nchw.shape
    Cout, _, KH, KW = weight.shape
    P = pooling_size
    OH = H + 2 * padding - KH + 1
    OW = W + 2 * padding - KW + 1
    PH = (OH - P) // 2 + 1
    PW = (OW - P) // 2 + 1
    HW = PH * PW
    K = Cin * KH * KW
    G = P * P

    # Pack Nb batches per grid step so the pooled lane axis L = Nb*HW reaches 128 lanes.
    Nb = max(1, 128 // HW) if HW <= 128 else 1
    Nb = min(Nb, max(N, 1))
    num_blocks = -(-N // Nb)
    Npad = num_blocks * Nb
    L = Nb * HW

    # bf16 BEFORE pad/slice: bit-identical (only data movement follows), half the bytes.
    xb = x_nchw.astype(jnp.bfloat16)
    if Npad != N:
        xb = jnp.pad(xb, ((0, Npad - N), (0, 0), (0, 0), (0, 0)))
    xp = jnp.pad(xb, ((0, 0), (0, 0), (padding, padding), (padding, padding)))

    # De-duplicate strided slices: extent is identical for every (dh,kh,dw,kw) combo,
    # only the combined start offset (dh+kh, dw+kw) matters.
    slice_cache = {}

    def get_slice(r0, c0):
        sl = slice_cache.get((r0, c0))
        if sl is None:
            sl = lax.slice(
                xp, (0, 0, r0, c0),
                (Npad, Cin, r0 + 2 * (PH - 1) + 1, c0 + 2 * (PW - 1) + 1),
                (1, 1, 2, 2))                                   # (Npad, Cin, PH, PW)
            slice_cache[(r0, c0)] = sl
        return sl

    groups = []
    for dh in range(P):
        for dw in range(P):
            taps = [get_slice(dh + kh, dw + kw)
                    for kh in range(KH) for kw in range(KW)]
            tap = jnp.stack(taps, axis=2)                       # (Npad, Cin, KH*KW, PH, PW)
            tap = tap.reshape(num_blocks, Nb, K, HW)            # row t = cin*KH*KW+kh*KW+kw
            tap = tap.transpose(0, 2, 1, 3).reshape(num_blocks, K, L)
            groups.append(tap)
    x_colT = jnp.concatenate(groups, axis=-1)                   # (num_blocks, K, G*L) bf16

    w_t = weight.reshape(Cout, K).astype(jnp.bfloat16)          # same row ordering
    b2 = bias.reshape(Cout, 1).astype(jnp.float32)
    dims = dict(N=N, Nb=Nb, num_blocks=num_blocks, Cout=Cout, K=K,
                PH=PH, PW=PW, HW=HW, L=L, G=G)
    return x_colT, w_t, b2, dims


def _unpack_output(out_blocks, d):
    """(num_blocks, Cout, L) with lane order (n_local, ph, pw) -> (N, Cout, PH, PW)."""
    y = out_blocks.reshape(d["num_blocks"], d["Cout"], d["Nb"], d["PH"], d["PW"])
    y = y.transpose(0, 2, 1, 3, 4).reshape(
        d["num_blocks"] * d["Nb"], d["Cout"], d["PH"], d["PW"])
    return y[:d["N"]]


@functools.partial(jax.jit, static_argnames=("padding", "pooling_size"))
def conv_tanh_abs_pool(x_nchw, weight, bias, *, padding, pooling_size):
    """x_nchw: (N, Cin, H, W); weight: (Cout, Cin, KH, KW); bias: (Cout,).  Returns NCHW."""
    x_colT, w_t, b2, d = _build_operands(x_nchw, weight, bias,
                                         padding=padding, pooling_size=pooling_size)
    num_blocks, Cout, K = d["num_blocks"], d["Cout"], d["K"]
    L, G = d["L"], d["G"]
    R = G * L

    kernel = functools.partial(_conv_tanh_abs_pool_kernel, L=L, G=G)
    out = pl.pallas_call(
        kernel,
        out_shape=jax.ShapeDtypeStruct((num_blocks, Cout, L), jnp.float32),
        grid=(num_blocks,),
        in_specs=[
            pl.BlockSpec((1, K, R), lambda i: (i, 0, 0)),       # per-block im2col tile
            pl.BlockSpec((Cout, K), lambda i: (0, 0)),          # weights, resident
            pl.BlockSpec((Cout, 1), lambda i: (0, 0)),          # bias, resident
        ],
        out_specs=pl.BlockSpec((1, Cout, L), lambda i: (i, 0, 0)),
        compiler_params=pltpu.CompilerParams(
            dimension_semantics=("parallel",)),                 # only matters if num_blocks > 1
        cost_estimate=pl.CostEstimate(
            flops=2 * num_blocks * Cout * K * R,
            transcendentals=num_blocks * Cout * R,
            bytes_accessed=x_colT.size * 2 + w_t.size * 2 + b2.size * 4
                           + num_blocks * Cout * L * 4),
    )(x_colT, w_t, b2)

    return _unpack_output(out, d)


@functools.partial(jax.jit, static_argnames=("padding", "pooling_size"))
def reference(x_nchw, weight, bias, *, padding, pooling_size):
    """Pure-JAX f32 reference mirroring the PyTorch forward."""
    y = jax.lax.conv_general_dilated(
        x_nchw, weight, window_strides=(1, 1),
        padding=[(padding, padding), (padding, padding)],
        dimension_numbers=("NCHW", "OIHW", "NCHW"),
        precision=jax.lax.Precision.HIGHEST)
    y = y + bias.reshape(1, -1, 1, 1)
    y = jnp.abs(jnp.tanh(y))
    return jax.lax.reduce_window(
        y, -jnp.inf, jax.lax.max,
        window_dimensions=(1, 1, pooling_size, pooling_size),
        window_strides=(1, 1, 2, 2), padding="VALID")


@functools.partial(jax.jit, static_argnames=("padding", "pooling_size"))
def emulate(x_nchw, weight, bias, *, padding, pooling_size):
    """XLA emulation of the *exact* kernel math (same bf16 operands / lane grouping)."""
    x_colT, w_t, b2, d = _build_operands(x_nchw, weight, bias,
                                         padding=padding, pooling_size=pooling_size)
    y = jnp.einsum("ok,bkr->bor", w_t, x_colT, preferred_element_type=jnp.float32)
    y = jnp.abs(jnp.tanh(y + b2[None]))
    y = y.reshape(d["num_blocks"], d["Cout"], d["G"], d["L"]).max(axis=2)
    return _unpack_output(y, d)


if __name__ == "__main__":
    # Module config: ConvTanhAbsPool(in_channels=4, out_channels=8, kernel_size=3,
    #                                pooling_size=2, padding=1)
    N, Cin, H, W = 2, 4, 16, 16
    Cout, KH, KW = 8, 3, 3
    padding, pooling_size = 1, 2

    key = jax.random.PRNGKey(0)
    kx, kw_, kb = jax.random.split(key, 3)
    x = jax.random.normal(kx, (N, Cin, H, W), dtype=jnp.float32)
    fan_in = Cin * KH * KW
    weight = jax.random.normal(kw_, (Cout, Cin, KH, KW), dtype=jnp.float32) / jnp.sqrt(fan_in)
    bias = jax.random.normal(kb, (Cout,), dtype=jnp.float32) * 0.1

    out = jax.block_until_ready(
        conv_tanh_abs_pool(x, weight, bias, padding=padding, pooling_size=pooling_size))
    ref = jax.block_until_ready(
        reference(x, weight, bias, padding=padding, pooling_size=pooling_size))
    emu = jax.block_until_ready(
        emulate(x, weight, bias, padding=padding, pooling_size=pooling_size))

    assert out.shape == ref.shape, (out.shape, ref.shape)
    # Tight check against an XLA emulation of the identical bf16 math (catches kernel bugs).
    err_emu = float(jnp.max(jnp.abs(out - emu)))
    assert err_emu < 1e-3, f"kernel vs emulation max abs err {err_emu}"
    # Looser check vs the f32 HIGHEST conv reference: bf16 MXU operands round each input
    # to 8 mantissa bits, giving up to ~5e-3 deviation at K=36 (tanh is contracting).
    err_ref = float(jnp.max(jnp.abs(out - ref)))
    assert err_ref < 2e-2, f"kernel vs f32 reference max abs err {err_ref}"
    print("KERNEL_OK")
</pallas_src>

<mosaic_0001>
module attributes {stable_mosaic.version = 11 : i64} {
  func.func @_conv_tanh_abs_pool_kernel(%arg0: i32, %arg1: memref<1x36x512xbf16, #tpu.memory_space<vmem>>, %arg2: memref<8x36xbf16, #tpu.memory_space<vmem>>, %arg3: memref<8x1xf32, #tpu.memory_space<vmem>>, %arg4: memref<1x8x128xf32, #tpu.memory_space<vmem>>) attributes {dimension_semantics = [#tpu.dimension_semantics<parallel>], iteration_bounds = array<i64: 1>, scalar_prefetch = 0 : i64, scratch_operands = 0 : i64, tpu.core_type = #tpu.core_type<tc>, window_params = [{transform_indices = @transform_0, window_bounds = array<i64: 1, 36, 512>}, {pipeline_mode = #tpu.pipeline_mode<synchronous>, transform_indices = @transform_1, window_bounds = array<i64: 8, 36>}, {pipeline_mode = #tpu.pipeline_mode<synchronous>, transform_indices = @transform_2, window_bounds = array<i64: 8, 1>}, {transform_indices = @transform_3, window_bounds = array<i64: 1, 8, 128>}]} {
    %c0 = arith.constant 0 : index
    %c0_0 = arith.constant 0 : index
    %0 = vector.load %arg2[%c0, %c0_0] : memref<8x36xbf16, #tpu.memory_space<vmem>>, vector<8x36xbf16>
    %c0_1 = arith.constant 0 : index
    %c0_2 = arith.constant 0 : index
    %c0_3 = arith.constant 0 : index
    %1 = vector.load %arg1[%c0_1, %c0_2, %c0_3] : memref<1x36x512xbf16, #tpu.memory_space<vmem>>, vector<1x36x512xbf16>
    %2 = vector.shape_cast %1 : vector<1x36x512xbf16> to vector<36x512xbf16>
    %cst = arith.constant dense<0.000000e+00> : vector<8x512xf32>
    %3 = tpu.matmul %0, %2, %cst {dimension_numbers = #tpu.dot_dimension_numbers<[1], [0], [0], [1], [0, 0, 1, 1], [], []>} : vector<8x36xbf16>, vector<36x512xbf16>, vector<8x512xf32> -> vector<8x512xf32>
    %c0_4 = arith.constant 0 : index
    %c0_5 = arith.constant 0 : index
    %4 = vector.load %arg3[%c0_4, %c0_5] : memref<8x1xf32, #tpu.memory_space<vmem>>, vector<8x1xf32>
    %5 = vector.broadcast %4 : vector<8x1xf32> to vector<8x512xf32>
    %6 = arith.addf %3, %5 : vector<8x512xf32>
    %7 = math.tanh %6 : vector<8x512xf32>
    %8 = math.absf %7 : vector<8x512xf32>
    %9 = vector.extract_strided_slice %8 {offsets = [0, 0], sizes = [8, 128], strides = [1, 1]} : vector<8x512xf32> to vector<8x128xf32>
    %10 = vector.extract_strided_slice %8 {offsets = [0, 128], sizes = [8, 128], strides = [1, 1]} : vector<8x512xf32> to vector<8x128xf32>
    %11 = arith.maximumf %9, %10 : vector<8x128xf32>
    %12 = vector.extract_strided_slice %8 {offsets = [0, 256], sizes = [8, 128], strides = [1, 1]} : vector<8x512xf32> to vector<8x128xf32>
    %13 = arith.maximumf %11, %12 : vector<8x128xf32>
    %14 = vector.extract_strided_slice %8 {offsets = [0, 384], sizes = [8, 128], strides = [1, 1]} : vector<8x512xf32> to vector<8x128xf32>
    %15 = arith.maximumf %13, %14 : vector<8x128xf32>
    %c0_6 = arith.constant 0 : index
    %c0_7 = arith.constant 0 : index
    %c0_8 = arith.constant 0 : index
    %16 = vector.load %arg4[%c0_6, %c0_7, %c0_8] : memref<1x8x128xf32, #tpu.memory_space<vmem>>, vector<1x8x128xf32>
    %17 = vector.shape_cast %16 : vector<1x8x128xf32> to vector<8x128xf32>
    %18 = vector.shape_cast %15 : vector<8x128xf32> to vector<1x8x128xf32>
    tpu.vector_store %arg4[%c0_6, %c0_7, %c0_8], %18 {strides = array<i32>} : memref<1x8x128xf32, #tpu.memory_space<vmem>>, vector<1x8x128xf32>,
    return
  }
  func.func @transform_0(%arg0: i32) -> (i32, i32, i32) {
    %c0_i32 = arith.constant 0 : i32
    %c0_i32_0 = arith.constant 0 : i32
    %c0_i32_1 = arith.constant 0 : i32
    return %arg0, %c0_i32, %c0_i32_0 : i32, i32, i32
  }
  func.func @transform_1(%arg0: i32) -> (i32, i32) {
    %c0_i32 = arith.constant 0 : i32
    %c0_i32_0 = arith.constant 0 : i32
    %c0_i32_1 = arith.constant 0 : i32
    return %c0_i32, %c0_i32_0 : i32, i32
  }
  func.func @transform_2(%arg0: i32) -> (i32, i32) {
    %c0_i32 = arith.constant 0 : i32
    %c0_i32_0 = arith.constant 0 : i32
    %c0_i32_1 = arith.constant 0 : i32
    return %c0_i32, %c0_i32_0 : i32, i32
  }
  func.func @transform_3(%arg0: i32) -> (i32, i32, i32) {
    %c0_i32 = arith.constant 0 : i32
    %c0_i32_0 = arith.constant 0 : i32
    %c0_i32_1 = arith.constant 0 : i32
    return %arg0, %c0_i32, %c0_i32_0 : i32, i32, i32
  }
}

</mosaic_0001>

<bundles_post_ra>
// kernel: conv_tanh_abs_pool.1
= control target key start
LH: loop header
LB: loop body
LE: loop exit
PB: predicated region body
PF: predicated region fallthrough
CT: control target
= control target key end

     0   :  { %v242_v1 = vmov 0   ;;  %vm86_vm0 = vcmask 1041408   ;;  %vm82_vm1 = vcmask 293888   ;;  %s306_s0 = inlined_call_operand.vmem [shape: bf16[1,36,512], index: 0, kind: input, shape index: {}]   ;;  %s307_s2 = inlined_call_operand.vmem [shape: f32[8,1], index: 2, kind: input, shape index: {}]   ;;  %s308_s1 = inlined_call_operand.vmem [shape: bf16[8,36], index: 1, kind: input, shape index: {}]   ;;  %s309_s3 = inlined_call_operand.vmem [shape: f32[1,8,128], index: 3, kind: output, shape index: {}]  }
   0x1   :  { %v215_v0 = vld [vmem:[%s306_s0 + $0x4] ss:$16 sps:$4 sm:$0xff]   ;;  %131 = vmatprep.mubr.bf16.mxu0 %v242_v1  ;;  %172 = vmatprep.mubr.bf16.mxu1 %v242_v1  ;;  %v217_v2 = vld [vmem:[%s306_s0 + $0xc] ss:$16 sps:$4 sm:$0xff]   ;;  %v219_v3 = vld [vmem:[%s306_s0] ss:$16 sps:$4 sm:$0xff]  }
   0x2   :  { %214 = vset.pattern.permute.xlu0 %v242_v1  ;;  %99 = vmatprep.subr.bf16.mxu0 %v215_v0  ;;  %v220_v4 = vld [vmem:[%s306_s0 + $0x8] ss:$16 sps:$4 sm:$0xff]   ;;  %v221_v5 = vld [vmem:[%s306_s0 + $0x24] ss:$16 sps:$4 sm:$0xff]   ;;  %v223_v6 = vld [vmem:[%s306_s0 + $0x2c] ss:$16 sps:$4 sm:$0xff]  }
   0x3   :  { %140 = vmatprep.subr.bf16.mxu1 %v217_v2  ;;  %100 = vmatpush1.bf16.msra.mxu0 %v219_v3  ;;  %v225_v7 = vld [vmem:[%s306_s0 + $0x20] ss:$16 sps:$4 sm:$0xff]   ;;  %v226_v8 = vld [vmem:[%s306_s0 + $0x28] ss:$16 sps:$4 sm:$0xff]  }
   0x4   :  { %141 = vmatpush1.bf16.msra.mxu1 %v220_v4  ;;  %101 = vmatprep.subr.bf16.mxu0 %v221_v5  ;;  %v24_v9 = vld [vmem:[%s306_s0 + $0x40] sm:$0x33]  ;;  %v25_v10 = vld [vmem:[%s306_s0 + $0x48] sm:$0x33] }
   0x5   :  { %142 = vmatprep.subr.bf16.mxu1 %v223_v6  ;;  %v206_v11 = vcombine.high %v24_v9, %v24_v9  ;;  %v208_v12 = vcombine.high %v25_v10, %v25_v10  ;;  %v205_v13 = vcombine.low %v24_v9, %v24_v9  ;;  %v207_v14 = vcombine.low %v25_v10, %v25_v10  ;;  %v26_v15 = vld [vmem:[%s307_s2] sm:$0xff] }
   0x6   :  { %29 = vperm.xlu0 %214, %v26_v15   ;;  %v15_v18 = vld [vmem:[%s308_s1] sm:$0xf] }
   0x7   :  { %102 = vmatpush1.bf16.msra.mxu0 %v225_v7  ;;  %v88_v16 = vsel %vm86_vm0, %v205_v13, 0  ;;  %v94_v17 = vsel %vm86_vm0, %v207_v14, 0 }
   0x8   :  { %143 = vmatpush1.bf16.msra.mxu1 %v226_v8  ;;  %209 = vmatprep.subr.msk.bf16.mxu0 %vm86_vm0, %v206_v11 }
   0x9   :  { %211 = vmatprep.subr.msk.bf16.mxu1 %vm86_vm0, %v208_v12 }
   0xb   :  { %104 = vmatpush1.bf16.msra.mxu0 %v88_v16 }
   0xc   :  { %145 = vmatpush1.bf16.msra.mxu1 %v94_v17 }
   0xe   :  { %210 = vmatmul.mubr.msk.bf16.vlgmr.msra.gmra.mrb[0].mxu0 %vm82_vm1, %v15_v18 }
   0xf   :  { %212 = vmatmul.mubr.msk.bf16.vlgmr.msra.gmra.mrb[0].mxu1 %vm82_vm1, %v15_v18 }
  0x85   :  { %v30_v19 = vpop.permute.xlu0 %29 }
  0xe1   :  { %v133_v20 = vpop.f32.mrb[0].mxu0 }
  0xe2   :  { %v174_v21 = vpop.f32.mrb[0].mxu1  ;;  %v134_v22 = vadd.f32 %v133_v20, %v30_v19  ;;  %v135_v24 = vpop.f32.mrb[1].mxu0 }
  0xe3   :  { %v175_v23 = vadd.f32 %v174_v21, %v30_v19  ;;  %v176_v25 = vpop.f32.mrb[1].mxu1  ;;  %v136_v26 = vadd.f32 %v135_v24, %v30_v19  ;;  %v137_v27 = vpop.f32.mrb[2].mxu0 }
  0xe4   :  { %v178_v28 = vpop.f32.mrb[2].mxu1  ;;  %231 = vtanh.f32 %v134_v22  ;;  %v177_v29 = vadd.f32 %v176_v25, %v30_v19  ;;  %v138_v30 = vpop.f32.mrb[3].mxu0 }
  0xe5   :  { %v179_v31 = vpop.f32.mrb[3].mxu1  ;;  %233 = vtanh.f32 %v175_v23 }
  0xe6   :  { %235 = vtanh.f32 %v136_v26 }
  0xe7   :  { %237 = vtanh.f32 %v177_v29 }
  0xee   :  { %v232_v32 = vpop.eup %231 }
  0xef   :  { %v234_v33 = vpop.eup %233 }
  0xf0   :  { %v236_v34 = vpop.eup %235 }
  0xf1   :  { %v238_v35 = vpop.eup %237  ;;  %239 = vmaxabs.init.f32.vacc0 %v232_v32, %v236_v34 }
  0xf3   :  { %240 = vmaxabs.f32.vacc0 %v234_v33, %v238_v35 }
  0xf5   :  { %v241_v36 = vmovacc.low.even.vacc0 }
  0xf7   :  { %192 = vst [vmem:[%s309_s3] sm:$0xff] %v241_v36 }

</bundles_post_ra>
